<compile_context>
chip_gen: v6e
topology: v6e:2x2x1
jax: 0.10.0
libtpu: 0.0.40
codegen_flags: <defaults>
</compile_context>

<pallas_src>
import functools

import numpy as np
import jax
import jax.numpy as jnp
from jax.experimental import pallas as pl
from jax.experimental.pallas import tpu as pltpu


def _round_up(n, m):
    return ((n + m - 1) // m) * m


def _choose_tile_b(B, max_tb=2048, min_tb=512):
    """Batch tile size.

    B <= 512       : one block (splitting tiny batches only adds per-step overhead).
    B  > 512       : >= 2 blocks (v7x has 2 TensorCores; grid=(1,) leaves one idle),
                     ~B/8 rows per tile (>= 4 steps for pipelining), clamped to
                     [512, max_tb].  Per-tile VMEM footprint at tb=2048 is ~5-6 MiB
                     incl. double buffers -- far under every chip's scoped limit.
    """
    if B <= min_tb:
        return int(B)
    return int(min(max_tb, max(min_tb, _round_up(-(-B // 8), 8))))


def _netj_kernel(x_ref, c_ref, w_ref, o_ref):
    """One batch tile of Net_J.

    x_ref : (TB, Dk)    augmented input rows [x, ||x||^2, 1],  Dk = Din + 2
    c_ref : (Dk, Hp)    rows 0..Din-1 = (2*sigma^2*centres)^T,
                        row Din = -sigma^2, row Din+1 = -sigma^2*||centre||^2,
                        hidden dim zero-padded to Hp (multiple of 128)
    w_ref : (Hp, Dout)  fc2 weight, rows zero-padded, columns pre-permuted so the
                        torch reshape/transpose(2,3)/reshape is a free view;
                        bf16 (fast path) or f32 (high-accuracy fallback)
    o_ref : (TB, Dout)
    """
    # exponent = -(sigma*||x-c||)^2 = x@(2 s^2 c)^T - s^2*||x||^2 - s^2*||c||^2,
    # all folded into one MXU matmul.  HIGHEST precision: the expansion relies on
    # cancellation of large terms, so this dot must be true f32 (not bf16 1-pass).
    e = jnp.dot(x_ref[...], c_ref[...],
                precision=jax.lax.Precision.HIGHEST,
                preferred_element_type=jnp.float32)            # (TB, Hp)

    # squared distance >= 0  =>  exponent <= 0; clamp away FP cancellation noise.
    theta = jnp.exp(jnp.minimum(e, 0.0))                       # (TB, Hp)
    # padded hidden units: e == 0 -> theta == 1, but their w rows are 0 -> no effect.

    w = w_ref[...]
    if w.dtype == jnp.bfloat16:
        # Dominant MXU work: bf16 x bf16 with f32 accumulation (single MXU pass).
        o = jnp.dot(theta.astype(jnp.bfloat16), w,
                    preferred_element_type=jnp.float32)        # (TB, Dout)
    else:
        # f32 fallback: make the precision explicit rather than relying on defaults.
        o = jnp.dot(theta, w,
                    precision=jax.lax.Precision.HIGHEST,
                    preferred_element_type=jnp.float32)        # (TB, Dout)

    o_ref[...] = o.astype(o_ref.dtype)


def prepare_net_j_params(centres, sigmas, w2, nFPs, *, w2_dtype=jnp.bfloat16):
    """Fold RBF scaling, fc2 and the output permutation into kernel-ready constants.

    centres : (H, Din)   fc1.centres
    sigmas  : (H,)       fc1.sigmas
    w2      : (Dout, H)  fc2.weight (torch layout), Dout = nFPs*3*12
    w2_dtype: bf16 (default, 3-6x cheaper on the MXU) or f32 (tightest accuracy).
    """
    H, Din = centres.shape
    Dout = nFPs * 3 * 12
    assert w2.shape == (Dout, H)

    centres = centres.astype(jnp.float32)
    s2 = sigmas.astype(jnp.float32) ** 2                        # (H,)
    cc = jnp.sum(centres * centres, axis=1)                     # (H,)

    Hp = _round_up(max(H, 128), 128)                            # full 128-lane tile
    Dk = Din + 2

    # Augmented "centre" matrix: exponent = [x, ||x||^2, 1] @ c_aug
    c_aug = jnp.zeros((Dk, Hp), jnp.float32)
    c_aug = c_aug.at[:Din, :H].set((centres * (2.0 * s2)[:, None]).T)
    c_aug = c_aug.at[Din, :H].set(-s2)
    c_aug = c_aug.at[Din + 1, :H].set(-s2 * cc)

    # Permute fc2 columns so the kernel output is already in (nFPs, 3, 12) order:
    #   out[:, f*3+a, b] = y_orig[:, f*36 + b*3 + a]
    perm = np.arange(Dout).reshape(nFPs, 12, 3).transpose(0, 2, 1).reshape(Dout)
    w2p = jnp.zeros((Hp, Dout), jnp.float32).at[:H, :].set(
        w2.astype(jnp.float32).T[:, perm])

    return c_aug, w2p.astype(w2_dtype)


@functools.partial(jax.jit, static_argnames=("nFPs", "max_tile_b", "out_dtype"))
def net_j_forward(x, c_aug, w2p, *, nFPs, max_tile_b=2048, out_dtype=jnp.float32):
    """x: (B, Din) f32; remaining args come from prepare_net_j_params.

    out_dtype=jnp.bfloat16 halves output writeback (the dominant HBM stream,
    worth ~45% of traffic on bandwidth-bound v5e) if the consumer tolerates it.
    """
    B, Din = x.shape
    Dk, Hp = c_aug.shape
    Dout = w2p.shape[1]
    assert Dout == nFPs * 3 * 12 and Dk == Din + 2

    # Fold the quadratic-expansion bias terms into the first matmul: append
    # [||x||^2, 1] columns.  Tiny wrapper op (B x 2 extra floats) that removes a
    # whole kernel input stream and a (TB,1)->(TB,Hp) broadcast-FMA.
    x = x.astype(jnp.float32)
    xx = jnp.sum(x * x, axis=-1, keepdims=True)
    x_aug = jnp.concatenate([x, xx, jnp.ones_like(xx)], axis=-1)   # (B, Dk)

    tb = _choose_tile_b(B, max_tile_b)
    grid = (pl.cdiv(B, tb),)
    # Ragged last block (B % tb != 0) is handled by Pallas (masked writes).
    # Dout=288 is kept unpadded: the (tb, 288) output block is contiguous in HBM
    # and writeback already dominates traffic -- padding would only add 33% more.

    y = pl.pallas_call(
        _netj_kernel,
        out_shape=jax.ShapeDtypeStruct((B, Dout), out_dtype),
        grid=grid,
        in_specs=[
            pl.BlockSpec((tb, Dk), lambda i: (i, 0)),       # batch-tiled input
            pl.BlockSpec((Dk, Hp), lambda i: (0, 0)),       # VMEM-resident params
            pl.BlockSpec((Hp, Dout), lambda i: (0, 0)),
        ],
        out_specs=pl.BlockSpec((tb, Dout), lambda i: (i, 0)),
        compiler_params=pltpu.CompilerParams(
            dimension_semantics=("parallel",),
            # explicit headroom for tb=2048 double-buffered tiles (<= v5e's 16 MiB
            # default would also fit, but make the ceiling explicit per review)
            vmem_limit_bytes=32 * 1024 * 1024),
    )(x_aug, c_aug, w2p)

    # Column permutation already baked into w2p -> this reshape is a free view.
    return y.reshape(B, 3 * nFPs, 12)


def _reference(x, centres, sigmas, w2, nFPs):
    # pure-JAX reference mirroring the torch module exactly (direct ||x-c||)
    d = x[:, None, :] - centres[None, :, :]                       # (B, H, Din)
    dist = jnp.sqrt(jnp.sum(d * d, axis=-1)) * sigmas[None, :]    # (B, H)
    theta = jnp.exp(-(dist ** 2))
    y = theta @ w2.T
    B = x.shape[0]
    return jnp.transpose(y.reshape(B, nFPs, 12, 3),
                         (0, 1, 3, 2)).reshape(B, 3 * nFPs, 12)


if __name__ == "__main__":
    nFPs = 8
    num_hidden_unit = 32
    Din = 3 * nFPs + 3 + 4 + 4          # 35
    Dout = nFPs * 3 * 12                # 288

    key = jax.random.PRNGKey(0)
    kx, kc, ks, kw, kx2, kc2, ks2 = jax.random.split(key, 7)

    # ---- main small-shape test: B=2, N(0,1) data -------------------------------
    B = 2
    x = jax.random.normal(kx, (B, Din), dtype=jnp.float32)
    centres = jax.random.normal(kc, (num_hidden_unit, Din), dtype=jnp.float32)
    sigmas = jax.random.uniform(ks, (num_hidden_unit,), dtype=jnp.float32,
                                minval=0.1, maxval=0.5)
    w2 = (jax.random.normal(kw, (Dout, num_hidden_unit), dtype=jnp.float32)
          * (1.0 / np.sqrt(num_hidden_unit)))

    ref = jax.block_until_ready(_reference(x, centres, sigmas, w2, nFPs))

    # fast path: bf16 fc2 weights on the second matmul
    p_bf16 = prepare_net_j_params(centres, sigmas, w2, nFPs, w2_dtype=jnp.bfloat16)
    out_bf16 = jax.block_until_ready(net_j_forward(x, *p_bf16, nFPs=nFPs))
    assert out_bf16.shape == (B, 3 * nFPs, 12)
    np.testing.assert_allclose(np.asarray(out_bf16), np.asarray(ref),
                               rtol=2e-2, atol=1e-2)

    # high-accuracy fallback: f32 fc2 weights, HIGHEST precision everywhere
    p_f32 = prepare_net_j_params(centres, sigmas, w2, nFPs, w2_dtype=jnp.float32)
    out_f32 = jax.block_until_ready(net_j_forward(x, *p_f32, nFPs=nFPs))
    np.testing.assert_allclose(np.asarray(out_f32), np.asarray(ref),
                               rtol=1e-4, atol=1e-4)

    # ---- realistically-scaled data test (exercises the expanded-quadratic
    #      cancellation: ||x||, ||c|| large relative to the distance) ------------
    B2 = 64
    x2 = 3.0 + 2.0 * jax.random.normal(kx2, (B2, Din), dtype=jnp.float32)
    centres2 = 3.0 + 2.0 * jax.random.normal(kc2, (num_hidden_unit, Din),
                                             dtype=jnp.float32)
    sigmas2 = jax.random.uniform(ks2, (num_hidden_unit,), dtype=jnp.float32,
                                 minval=0.05, maxval=0.3)
    ref2 = jax.block_until_ready(_reference(x2, centres2, sigmas2, w2, nFPs))
    p2_f32 = prepare_net_j_params(centres2, sigmas2, w2, nFPs, w2_dtype=jnp.float32)
    out2 = jax.block_until_ready(net_j_forward(x2, *p2_f32, nFPs=nFPs))
    np.testing.assert_allclose(np.asarray(out2), np.asarray(ref2),
                               rtol=1e-3, atol=1e-3)

    print("KERNEL_OK")
</pallas_src>

<mosaic_0001>
module attributes {stable_mosaic.version = 11 : i64} {
  func.func @_netj_kernel(%arg0: i32, %arg1: memref<2x37xf32, #tpu.memory_space<vmem>>, %arg2: memref<37x128xf32, #tpu.memory_space<vmem>>, %arg3: memref<128x288xbf16, #tpu.memory_space<vmem>>, %arg4: memref<2x288xf32, #tpu.memory_space<vmem>>) attributes {dimension_semantics = [#tpu.dimension_semantics<parallel>], iteration_bounds = array<i64: 1>, scalar_prefetch = 0 : i64, scratch_operands = 0 : i64, tpu.core_type = #tpu.core_type<tc>, window_params = [{transform_indices = @transform_0, window_bounds = array<i64: 2, 37>}, {pipeline_mode = #tpu.pipeline_mode<synchronous>, transform_indices = @transform_1, window_bounds = array<i64: 37, 128>}, {pipeline_mode = #tpu.pipeline_mode<synchronous>, transform_indices = @transform_2, window_bounds = array<i64: 128, 288>}, {transform_indices = @transform_3, window_bounds = array<i64: 2, 288>}]} {
    %c0 = arith.constant 0 : index
    %c0_0 = arith.constant 0 : index
    %0 = vector.load %arg1[%c0, %c0_0] : memref<2x37xf32, #tpu.memory_space<vmem>>, vector<2x37xf32>
    %c0_1 = arith.constant 0 : index
    %c0_2 = arith.constant 0 : index
    %1 = vector.load %arg2[%c0_1, %c0_2] : memref<37x128xf32, #tpu.memory_space<vmem>>, vector<37x128xf32>
    %cst = arith.constant dense<0.000000e+00> : vector<2x128xf32>
    %2 = tpu.matmul %0, %1, %cst {dimension_numbers = #tpu.dot_dimension_numbers<[1], [0], [0], [1], [0, 0, 1, 1], [], []>, precision = #tpu.contract_precision<fp32>} : vector<2x37xf32>, vector<37x128xf32>, vector<2x128xf32> -> vector<2x128xf32>
    %cst_3 = arith.constant 0.000000e+00 : f32
    %3 = vector.broadcast %cst_3 : f32 to vector<2x128xf32>
    %4 = arith.minimumf %2, %3 : vector<2x128xf32>
    %5 = math.exp %4 : vector<2x128xf32>
    %c0_4 = arith.constant 0 : index
    %c0_5 = arith.constant 0 : index
    %6 = vector.load %arg3[%c0_4, %c0_5] : memref<128x288xbf16, #tpu.memory_space<vmem>>, vector<128x288xbf16>
    %7 = arith.truncf %5 : vector<2x128xf32> to vector<2x128xbf16>
    %cst_6 = arith.constant dense<0.000000e+00> : vector<2x288xf32>
    %8 = tpu.matmul %7, %6, %cst_6 {dimension_numbers = #tpu.dot_dimension_numbers<[1], [0], [0], [1], [0, 0, 1, 1], [], []>} : vector<2x128xbf16>, vector<128x288xbf16>, vector<2x288xf32> -> vector<2x288xf32>
    %c0_7 = arith.constant 0 : index
    %c0_8 = arith.constant 0 : index
    %9 = vector.load %arg4[%c0_7, %c0_8] : memref<2x288xf32, #tpu.memory_space<vmem>>, vector<2x288xf32>
    tpu.vector_store %arg4[%c0_7, %c0_8], %8 {strides = array<i32>} : memref<2x288xf32, #tpu.memory_space<vmem>>, vector<2x288xf32>,
    return
  }
  func.func @transform_0(%arg0: i32) -> (i32, i32) {
    %c0_i32 = arith.constant 0 : i32
    %c0_i32_0 = arith.constant 0 : i32
    return %arg0, %c0_i32 : i32, i32
  }
  func.func @transform_1(%arg0: i32) -> (i32, i32) {
    %c0_i32 = arith.constant 0 : i32
    %c0_i32_0 = arith.constant 0 : i32
    %c0_i32_1 = arith.constant 0 : i32
    return %c0_i32, %c0_i32_0 : i32, i32
  }
  func.func @transform_2(%arg0: i32) -> (i32, i32) {
    %c0_i32 = arith.constant 0 : i32
    %c0_i32_0 = arith.constant 0 : i32
    %c0_i32_1 = arith.constant 0 : i32
    return %c0_i32, %c0_i32_0 : i32, i32
  }
  func.func @transform_3(%arg0: i32) -> (i32, i32) {
    %c0_i32 = arith.constant 0 : i32
    %c0_i32_0 = arith.constant 0 : i32
    return %arg0, %c0_i32 : i32, i32
  }
}

</mosaic_0001>

<bundles_post_ra>
// kernel: net_j_forward.1
= control target key start
LH: loop header
LB: loop body
LE: loop exit
PB: predicated region body
PF: predicated region fallthrough
CT: control target
= control target key end

     0   :  { %vm25_vm0 = vcmask 1044480   ;;  %v1007_v0 = vmov 0.0   ;;  %vm21_vm1 = vcmask 302080   ;;  %vm1008_vm2 = vmmov 0   ;;  %s1237_s1 = inlined_call_operand.vmem [shape: f32[37,128], index: 1, kind: input, shape index: {}]   ;;  %s1238_s0 = inlined_call_operand.vmem [shape: f32[2,37], index: 0, kind: input, shape index: {}]   ;;  %s1239_s2 = inlined_call_operand.vmem [shape: bf16[128,288], index: 2, kind: input, shape index: {}]   ;;  %s1240_s3 = inlined_call_operand.vmem [shape: f32[2,288], index: 3, kind: output, shape index: {}]  }
   0x1   :  { %871 = vmatprep.subr.mxu0 %v1007_v0  ;;  %v20_v1 = vld [vmem:[%s1237_s1 + $0x20] sm:$0x1f]  ;;  %v19_v2 = vld [vmem:[%s1237_s1 + $0x18] sm:$0xff]  ;;  %v18_v3 = vld [vmem:[%s1237_s1 + $0x10] sm:$0xff]  ;;  %884 = vmatprep.subr.mxu1 %v1007_v0  ;;  %v1009_v63 = vmov 0   ;;  %vm792_vm3 = vcmask 1041408  }
   0x2   :  { %v27_v4 = vsel %vm25_vm0, %v20_v1, 0  ;;  %v1042_v5 = vand.u32 4294901760, %v19_v2  ;;  %v1044_v6 = vand.u32 4294901760, %v18_v3  ;;  %v17_v7 = vld [vmem:[%s1237_s1 + $0x8] sm:$0xff]  ;;  %v16_v8 = vld [vmem:[%s1237_s1] sm:$0xff]  ;;  %881 = vmatprep.mubr.msk.f32.mxu0 %vm1008_vm2, %v1007_v0  ;;  %894 = vmatprep.mubr.msk.f32.mxu1 %vm1008_vm2, %v1007_v0  ;;  %vm793_vm4 = vcmask 1043458  }
   0x3   :  { %v1056_v9 = vand.u32 4294901760, %v27_v4  ;;  %v1058_v10 = vand.u32 4294901760, %v17_v7  ;;  %v1060_v11 = vand.u32 4294901760, %v16_v8  ;;  %v15_v12 = vld [vmem:[%s1238_s0] sm:$0x3]  ;;  %vm794_vm5 = vmor %vm793_vm4, %vm792_vm3  ;;  %vm795_vm6 = vcmask 259076  }
   0x4   :  { %v23_v13 = vsel %vm21_vm1, %v15_v12, 0  ;;  %v1066_v14 = vsub.f32 %v19_v2, %v1042_v5  ;;  %v1069_v15 = vsub.f32 %v18_v3, %v1044_v6  ;;  %v973_v39 = vld [vmem:[%s1239_s2 + $0xa8] ss:$12 sps:$4 sm:$0xff]   ;;  %v975_v40 = vld [vmem:[%s1239_s2 + $0xac] ss:$12 sps:$4 sm:$0xff]   ;;  %vm796_vm7 = vmor %vm795_vm6, %vm794_vm5 }
   0x5   :  { %872 = vmatpush3.msra.mxu0 %v1056_v9  ;;  %v133_v16 = vsub.f32 %v27_v4, %v1056_v9  ;;  %v1073_v17 = vand.u32 4294901760, %v23_v13  ;;  %v1076_v18 = vsub.f32 %v17_v7, %v1058_v10  ;;  %v1079_v19 = vsub.f32 %v16_v8, %v1060_v11  ;;  %v976_v41 = vld [vmem:[%s1239_s2 + $0xb0] ss:$12 sps:$4 sm:$0xff]   ;;  %v979_v43 = vld [vmem:[%s1239_s2 + $0x94] ss:$12 sps:$4 sm:$0xff]  }
   0x6   :  { %873 = vmatprep.subr.mxu0 %v1007_v0  ;;  %v141_v20 = vand.u32 4294901760, %v1066_v14  ;;  %v148_v21 = vand.u32 4294901760, %v1069_v15  ;;  %v977_v42 = vld [vmem:[%s1239_s2 + $0x90] ss:$12 sps:$4 sm:$0xff]   ;;  %v980_v44 = vld [vmem:[%s1239_s2 + $0x98] ss:$12 sps:$4 sm:$0xff]  }
   0x7   :  { %874 = vmatpush3.msra.mxu0 %v1042_v5  ;;  %v134_v22 = vand.u32 4294901760, %v133_v16  ;;  %v1086_v23 = vsub.f32 %v23_v13, %v1073_v17  ;;  %v155_v24 = vand.u32 4294901760, %v1076_v18  ;;  %v162_v29 = vand.u32 4294901760, %v1079_v19  ;;  %v983_v45 = vld [vmem:[%s1239_s2 + $0x7c] ss:$12 sps:$4 sm:$0xff]  }
   0x8   :  { %875 = vmatprep.subr.mxu0 %v1007_v0  ;;  %v142_v25 = vsub.f32 %v1066_v14, %v141_v20  ;;  %v149_v28 = vsub.f32 %v1069_v15, %v148_v21  ;;  %v981_v46 = vld [vmem:[%s1239_s2 + $0x78] ss:$12 sps:$4 sm:$0xff]   ;;  %v984_v47 = vld [vmem:[%s1239_s2 + $0x80] ss:$12 sps:$4 sm:$0xff]   ;;  %v988_v50 = vld [vmem:[%s1239_s2 + $0x68] ss:$12 sps:$4 sm:$0xff]  }
   0x9   :  { %876 = vmatpush3.msra.mxu0 %v1044_v6  ;;  %v135_v26 = vsub.f32 %v133_v16, %v134_v22  ;;  %v101_v27 = vand.u32 4294901760, %v1086_v23  ;;  %v156_v33 = vsub.f32 %v1076_v18, %v155_v24  ;;  %v163_v36 = vsub.f32 %v1079_v19, %v162_v29  ;;  %v987_v48 = vld [vmem:[%s1239_s2 + $0x64] ss:$12 sps:$4 sm:$0xff]   ;;  %v985_v49 = vld [vmem:[%s1239_s2 + $0x60] ss:$12 sps:$4 sm:$0xff]  }
   0xa   :  { %877 = vmatprep.subr.mxu0 %v1007_v0  ;;  %v143_v32 = vand.u32 4294901760, %v142_v25  ;;  %v150_v35 = vand.u32 4294901760, %v149_v28  ;;  %v991_v51 = vld [vmem:[%s1239_s2 + $0x4c] ss:$12 sps:$4 sm:$0xff]   ;;  %v989_v52 = vld [vmem:[%s1239_s2 + $0x48] ss:$12 sps:$4 sm:$0xff]  }
   0xb   :  { %878 = vmatpush3.msra.mxu0 %v1058_v10  ;;  %v136_v30 = vand.u32 4294901760, %v135_v26  ;;  %v102_v31 = vsub.f32 %v1086_v23, %v101_v27  ;;  %v157_v37 = vand.u32 4294901760, %v156_v33  ;;  %v164_v38 = vand.u32 4294901760, %v163_v36  ;;  %v992_v53 = vld [vmem:[%s1239_s2 + $0x50] ss:$12 sps:$4 sm:$0xff]  }
   0xc   :  { %879 = vmatprep.subr.mxu0 %v1007_v0  ;;  %v995_v54 = vld [vmem:[%s1239_s2 + $0x34] ss:$12 sps:$4 sm:$0xff]   ;;  %v993_v55 = vld [vmem:[%s1239_s2 + $0x30] ss:$12 sps:$4 sm:$0xff]   ;;  %v996_v56 = vld [vmem:[%s1239_s2 + $0x38] ss:$12 sps:$4 sm:$0xff]  }
   0xd   :  { %880 = vmatpush3.msra.mxu0 %v1060_v11  ;;  %885 = vmatpush3.msra.mxu1 %v136_v30  ;;  %v103_v34 = vand.u32 4294901760, %v102_v31  ;;  %v999_v57 = vld [vmem:[%s1239_s2 + $0x1c] ss:$12 sps:$4 sm:$0xff]   ;;  %v997_v58 = vld [vmem:[%s1239_s2 + $0x18] ss:$12 sps:$4 sm:$0xff]  }
   0xe   :  { %886 = vmatprep.subr.mxu1 %v1007_v0  ;;  %897 = vmatprep.subr.mxu0 %v1007_v0  ;;  %v1000_v59 = vld [vmem:[%s1239_s2 + $0x20] ss:$12 sps:$4 sm:$0xff]   ;;  %v1003_v60 = vld [vmem:[%s1239_s2 + $0x4] ss:$12 sps:$4 sm:$0xff]   ;;  %v1004_v62 = vld [vmem:[%s1239_s2 + $0x8] ss:$12 sps:$4 sm:$0xff]  }
   0xf   :  { %882 = vmatmul.mubr.f32.vlgmr.msra.gmra.mxu0 %v103_v34  ;;  %887 = vmatpush3.msra.mxu1 %v143_v32  ;;  %v1001_v61 = vld [vmem:[%s1239_s2] ss:$12 sps:$4 sm:$0xff]  }
  0x10   :  { %898 = vmatpush3.msra.mxu0 %v133_v16  ;;  %888 = vmatprep.subr.mxu1 %v1007_v0 }
  0x11   :  { %899 = vmatprep.subr.mxu0 %v1007_v0  ;;  %889 = vmatpush3.msra.mxu1 %v150_v35 }
  0x12   :  { %900 = vmatpush3.msra.mxu0 %v1066_v14  ;;  %890 = vmatprep.subr.mxu1 %v1007_v0 }
  0x13   :  { %901 = vmatprep.subr.mxu0 %v1007_v0  ;;  %891 = vmatpush3.msra.mxu1 %v157_v37 }
  0x14   :  { %902 = vmatpush3.msra.mxu0 %v1069_v15  ;;  %892 = vmatprep.subr.mxu1 %v1007_v0 }
  0x15   :  { %903 = vmatprep.subr.mxu0 %v1007_v0  ;;  %893 = vmatpush3.msra.mxu1 %v164_v38 }
  0x16   :  { %904 = vmatpush3.msra.mxu0 %v1076_v18  ;;  %895 = vmatmul.mubr.f32.vlgmr.msra.gmra.mxu1 %v1073_v17 }
  0x17   :  { %905 = vmatprep.subr.mxu0 %v1007_v0  ;;  %910 = vmatprep.subr.mxu1 %v1007_v0 }
  0x18   :  { %906 = vmatpush3.msra.mxu0 %v1079_v19  ;;  %907 = vmatprep.mubr.msk.f32.mxu0 %vm1008_vm2, %v1007_v0 }
  0x19   :  { %911 = vmatpush3.msra.mxu1 %v1056_v9  ;;  %908 = vmatmul.mubr.f32.vlgmr.msra.gmra.mxu0 %v1086_v23  ;;  %v779_v23 = vlaneseq }
  0x1a   :  { %912 = vmatprep.subr.mxu1 %v1007_v0  ;;  %923 = vmatprep.subr.mxu0 %v1007_v0 }
  0x1b   :  { %913 = vmatpush3.msra.mxu1 %v1042_v5  ;;  %924 = vmatpush3.msra.mxu0 %v134_v22  ;;  %v780_v25 = vshrl.u32 %v779_v23, 7 }
  0x1c   :  { %914 = vmatprep.subr.mxu1 %v1007_v0  ;;  %925 = vmatprep.subr.mxu0 %v1007_v0 }
  0x1d   :  { %915 = vmatpush3.msra.mxu1 %v1044_v6  ;;  %926 = vmatpush3.msra.mxu0 %v141_v20 }
  0x1e   :  { %916 = vmatprep.subr.mxu1 %v1007_v0  ;;  %927 = vmatprep.subr.mxu0 %v1007_v0 }
  0x1f   :  { %917 = vmatpush3.msra.mxu1 %v1058_v10  ;;  %928 = vmatpush3.msra.mxu0 %v148_v21  ;;  %v1010_v21 = vmov 1983009808  }
  0x20   :  { %918 = vmatprep.subr.mxu1 %v1007_v0  ;;  %929 = vmatprep.subr.mxu0 %v1007_v0  ;;  %v777_v22 = vunpack.c.l.s4 %v1010_v21 }
  0x21   :  { %919 = vmatpush3.msra.mxu1 %v1060_v11  ;;  %920 = vmatprep.mubr.msk.f32.mxu1 %vm1008_vm2, %v1007_v0 }
  0x22   :  { %930 = vmatpush3.msra.mxu0 %v155_v24  ;;  %921 = vmatmul.mubr.f32.vlgmr.msra.gmra.mxu1 %v101_v27  ;;  %v778_v24 = vunpack.c.0.s8 %v777_v22 }
  0x23   :  { %931 = vmatprep.subr.mxu0 %v1007_v0  ;;  %936 = vmatprep.subr.mxu1 %v1007_v0 }
  0x24   :  { %932 = vmatpush3.msra.mxu0 %v162_v29  ;;  %933 = vmatprep.mubr.msk.f32.mxu0 %vm1008_vm2, %v1007_v0  ;;  %v781_v28 = vsub.s32 %v778_v24, %v780_v25 }
  0x25   :  { %937 = vmatpush3.msra.mxu1 %v1056_v9  ;;  %934 = vmatmul.mubr.f32.vlgmr.msra.gmra.mxu0 %v1073_v17 }
  0x26   :  { %938 = vmatprep.subr.mxu1 %v1007_v0  ;;  %946 = vmatprep.mubr.msk.f32.mxu1 %vm1008_vm2, %v1007_v0 }
  0x27   :  { %939 = vmatpush3.msra.mxu1 %v1042_v5  ;;  %691 = vmatprep.subr.bf16.mxu0 %v975_v40 }
  0x28   :  { %940 = vmatprep.subr.mxu1 %v1007_v0  ;;  %692 = vmatpush1.bf16.msra.mxu0 %v973_v39 }
  0x29   :  { %941 = vmatpush3.msra.mxu1 %v1044_v6  ;;  %693 = vmatprep.subr.bf16.mxu0 %v979_v43 }
  0x2a   :  { %942 = vmatprep.subr.mxu1 %v1007_v0  ;;  %723 = vmatprep.mubr.bf16.mxu0 %v1009_v63 }
  0x2b   :  { %943 = vmatpush3.msra.mxu1 %v1058_v10 }
  0x2c   :  { %944 = vmatprep.subr.mxu1 %v1007_v0  ;;  %694 = vmatpush1.bf16.msra.mxu0 %v977_v42 }
  0x2d   :  { %945 = vmatpush3.msra.mxu1 %v1060_v11  ;;  %695 = vmatprep.subr.bf16.mxu0 %v983_v45 }
  0x2e   :  { %947 = vmatmul.mubr.f32.vlgmr.msra.gmra.mxu1 %v1073_v17  ;;  %949 = vmatprep.subr.bf16.mxu1 %v1007_v0 }
  0x2f   :  { %965 = vmatprep.mubr.msk.bf16.mxu1 %vm1008_vm2, %v1007_v0  ;;  %950 = vmatpush3.bf16.msra.mxu1 %v976_v41 }
  0x30   :  { %951 = vmatprep.subr.bf16.mxu1 %v1007_v0  ;;  %696 = vmatpush1.bf16.msra.mxu0 %v981_v46 }
  0x31   :  { %697 = vmatprep.subr.bf16.mxu0 %v987_v48 }
  0x33   :  { %952 = vmatpush3.bf16.msra.mxu1 %v980_v44 }
  0x34   :  { %953 = vmatprep.subr.bf16.mxu1 %v1007_v0  ;;  %698 = vmatpush1.bf16.msra.mxu0 %v985_v49 }
  0x35   :  { %699 = vmatprep.subr.bf16.mxu0 %v991_v51 }
  0x37   :  { %954 = vmatpush3.bf16.msra.mxu1 %v984_v47 }
  0x38   :  { %955 = vmatprep.subr.bf16.mxu1 %v1007_v0  ;;  %700 = vmatpush1.bf16.msra.mxu0 %v989_v52 }
  0x39   :  { %701 = vmatprep.subr.bf16.mxu0 %v995_v54 }
  0x3b   :  { %956 = vmatpush3.bf16.msra.mxu1 %v988_v50 }
  0x3c   :  { %957 = vmatprep.subr.bf16.mxu1 %v1007_v0  ;;  %702 = vmatpush1.bf16.msra.mxu0 %v993_v55 }
  0x3d   :  { %703 = vmatprep.subr.bf16.mxu0 %v999_v57 }
  0x3f   :  { %958 = vmatpush3.bf16.msra.mxu1 %v992_v53 }
  0x40   :  { %959 = vmatprep.subr.bf16.mxu1 %v1007_v0  ;;  %704 = vmatpush1.bf16.msra.mxu0 %v997_v58 }
  0x41   :  { %705 = vmatprep.subr.bf16.mxu0 %v1003_v60 }
  0x43   :  { %960 = vmatpush3.bf16.msra.mxu1 %v996_v56 }
  0x44   :  { %961 = vmatprep.subr.bf16.mxu1 %v1007_v0  ;;  %706 = vmatpush1.bf16.msra.mxu0 %v1001_v61 }
  0x47   :  { %962 = vmatpush3.bf16.msra.mxu1 %v1000_v59 }
  0x48   :  { %963 = vmatprep.subr.bf16.mxu1 %v1007_v0 }
  0x4b   :  { %964 = vmatpush3.bf16.msra.mxu1 %v1004_v62 }
  0xcf   :  { %v105_v1 = vpop.f32.mrf.mxu0 }
  0xd1   :  { %v883_v2 = vpop.f32.mrf.mxu0 }
  0xd6   :  { %v201_v3 = vpop.f32.mrf.mxu1 }
  0xd7   :  { %v202_v8 = vadd.f32 %v201_v3, %v105_v1 }
  0xd8   :  { %v896_v4 = vpop.f32.mrf.mxu1 }
  0xd9   :  { %v283_v5 = vpop.f32.mrf.mxu0 }
  0xda   :  { %v284_v0 = vadd.f32 %v283_v5, %v202_v8 }
  0xdb   :  { %v909_v6 = vpop.f32.mrf.mxu0 }
  0xe2   :  { %v361_v7 = vpop.f32.mrf.mxu1 }
  0xe3   :  { %v362_v12 = vadd.f32 %v361_v7, %v284_v0 }
  0xe4   :  { %v922_v9 = vpop.f32.mrf.mxu1 }
  0xe5   :  { %v447_v10 = vpop.f32.mrf.mxu0 }
  0xe6   :  { %v448_v13 = vadd.f32 %v447_v10, %v362_v12 }
  0xe7   :  { %v935_v11 = vpop.f32.mrf.mxu0 }
  0xee   :  { %v523_v14 = vpop.f32.mrf.mxu1 }
  0xef   :  { %v524_v15 = vadd.f32 %v523_v14, %v448_v13 }
  0xf0   :  { %v948_v16 = vpop.f32.mrf.mxu1 }
  0xf1   :  { %v527_v17 = vmin.f32 %v524_v15, 0.0 }
  0xf3   :  { %v528_v18 = vmul.f32 1.442695, %v527_v17 }
  0xf5   :  { %1005 = vpow2.f32 %v528_v18 }
 0x102   :  { %v1006_v19 = vpop.eup %1005 }
 0x103   :  { %v562_v20 = vpack.c.bf16 %v1006_v19, %v1006_v19 }
 0x105   :  { %724 = vmatmul.mubr.bf16.vlgmr.msra.gmra.mxu0 %v562_v20  ;;  %966 = vmatmul.mubr.bf16.vlgmr.msra.gmra.mxu1 %v562_v20 }
 0x1c5   :  { %v725_v26 = vpop.f32.mrf.mxu0  ;;  %v766_v27 = vpop.f32.mrf.mxu1 }
 0x1c6   :  { %v789_v34 = vrot.slane %v766_v27, %v781_v28 }
 0x1c7   :  { %v727_v29 = vpop.f32.mrf.mxu0  ;;  %v967_v30 = vpop.f32.mrf.mxu1 }
 0x1c8   :  { %v775_v31 = vcombine.low %v725_v26, %v727_v29 }
 0x1c9   :  { %v729_v32 = vpop.f32.mrf.mxu0  ;;  %v769_v33 = vpop.f32.mrf.mxu1 }
 0x1ca   :  { %v782_v35 = vrot.slane %v775_v31, %v781_v28 }
 0x1cb   :  { %v730_v36 = vpop.f32.mrf.mxu0  ;;  %v968_v37 = vpop.f32.mrf.mxu1 }
 0x1cc   :  { %v790_v38 = vcombine.low %v782_v35, %v789_v34 }
 0x1ce   :  { %797 = vst.msk [vmem:[%s1240_s3] sm:$0x3f] %vm796_vm7, %v790_v38 }

</bundles_post_ra>
